<compile_context>
chip_gen: v6e
topology: v6e:2x2x1
jax: 0.10.0
libtpu: 0.0.40
codegen_flags: <defaults>
</compile_context>

<pallas_src>
import jax
import jax.numpy as jnp
from jax import lax
from jax.experimental import pallas as pl
from jax.experimental.pallas import tpu as pltpu


def _round_up(x: int, m: int) -> int:
    return ((x + m - 1) // m) * m


def policy_kernel(h_ref, w1_ref, b1_ref, w2_ref, b2_ref, rand_ref,
                  act_ref, prob_ref):
    # fc1, transposed: contract w1 (P, H) with hidden tile (tm, H) over H.
    # Result (P, tm) keeps batch on the lane axis; f32 in, f32 accumulate.
    y = lax.dot_general(
        w1_ref[...], h_ref[...],
        dimension_numbers=(((1,), (1,)), ((), ())),
        preferred_element_type=jnp.float32)
    y = jnp.maximum(y + b1_ref[...], 0.0)              # bias (P, 1) -> lanes

    # fc2: (A, P) @ (P, tm) -> (A, tm); A sits on the sublane axis.
    z = jnp.dot(w2_ref[...], y, preferred_element_type=jnp.float32)
    z = z + b2_ref[...]                                 # bias (A, 1)

    probs = jax.nn.sigmoid(z)                           # EUP
    prob_ref[...] = probs
    # Threshold(probs - rand_vec): (x > 0).float(); rand (A, 1) broadcasts over batch.
    act_ref[...] = (probs - rand_ref[...] > 0.0).astype(jnp.float32)


def _choose_tm(B: int, block_b: int) -> int:
    """Pick the batch tile: one full block for small B, else a multiple of 128
    capped at block_b and small enough to yield >= 2 grid steps (v7x megacore)."""
    if B < 256:
        return B                                        # single block == full dims
    half = -(-B // 2)                                   # ceil(B / 2)
    return min(block_b, _round_up(half, 128))


def policy_forward(hidden, w1, b1, w2, b2, rand_vec, *, block_b: int = 2048):
    """hidden: (B, H) f32.
    w1: (P, H), b1: (P,), w2: (A, P), b2: (A,)  -- torch's native (out, in) layout.
    rand_vec: (1, A) or (A,).
    Returns (actions, probs), each (B, A) float32.
    """
    B, H = hidden.shape
    P = w1.shape[0]
    A = w2.shape[0]

    # Tiny reshapes/casts (biases & rand become column vectors so they broadcast
    # over the lane/batch axis inside the kernel).
    hidden = hidden.astype(jnp.float32)
    w1_f = w1.astype(jnp.float32)
    w2_f = w2.astype(jnp.float32)
    b1_c = b1.reshape(P, 1).astype(jnp.float32)
    b2_c = b2.reshape(A, 1).astype(jnp.float32)
    rand_c = rand_vec.reshape(A, 1).astype(jnp.float32)

    tm = _choose_tm(B, block_b)
    grid = (pl.cdiv(B, tm),)                            # ragged last block handled by Pallas

    actions_t, probs_t = pl.pallas_call(
        policy_kernel,
        out_shape=(
            jax.ShapeDtypeStruct((A, B), jnp.float32),  # actions, batch on lanes
            jax.ShapeDtypeStruct((A, B), jnp.float32),  # probs,   batch on lanes
        ),
        grid=grid,
        in_specs=[
            pl.BlockSpec((tm, H), lambda i: (i, 0)),    # hidden tile streams
            pl.BlockSpec((P, H), lambda i: (0, 0)),     # weights stay VMEM-resident
            pl.BlockSpec((P, 1), lambda i: (0, 0)),
            pl.BlockSpec((A, P), lambda i: (0, 0)),
            pl.BlockSpec((A, 1), lambda i: (0, 0)),
            pl.BlockSpec((A, 1), lambda i: (0, 0)),
        ],
        out_specs=(
            pl.BlockSpec((A, tm), lambda i: (0, i)),
            pl.BlockSpec((A, tm), lambda i: (0, i)),
        ),
        compiler_params=pltpu.CompilerParams(
            dimension_semantics=("parallel",)),
    )(hidden, w1_f, b1_c, w2_f, b2_c, rand_c)

    # Return in the module's (B, A) convention (tiny transpose: A * B * 4 bytes).
    return actions_t.T, probs_t.T


def init_params(key, hidden_dim, n_policy_hidden, n_actions):
    """Deterministic init mimicking nn.Linear default (uniform +/- 1/sqrt(fan_in)),
    stored in torch's native (out, in) layout."""
    k1, k2, k3, k4 = jax.random.split(key, 4)
    lim1 = 1.0 / jnp.sqrt(hidden_dim)
    lim2 = 1.0 / jnp.sqrt(n_policy_hidden)
    w1 = jax.random.uniform(k1, (n_policy_hidden, hidden_dim), jnp.float32, -lim1, lim1)
    b1 = jax.random.uniform(k2, (n_policy_hidden,), jnp.float32, -lim1, lim1)
    w2 = jax.random.uniform(k3, (n_actions, n_policy_hidden), jnp.float32, -lim2, lim2)
    b2 = jax.random.uniform(k4, (n_actions,), jnp.float32, -lim2, lim2)
    return w1, b1, w2, b2


if __name__ == "__main__":
    # small shapes consistent with the module
    batch = 2
    hidden_dim = 32
    n_policy_hidden = 64
    n_actions = 8

    key = jax.random.PRNGKey(0)
    k_param, k_in, k_rand = jax.random.split(key, 3)

    w1, b1, w2, b2 = init_params(k_param, hidden_dim, n_policy_hidden, n_actions)
    hidden = jax.random.normal(k_in, (batch, hidden_dim), jnp.float32)
    # torch.rand((1, act_dim)) equivalent, generated deterministically in the wrapper.
    # TODO(synk): rand_vec is drawn outside the kernel (torch draws it inside forward
    # on every call); callers must re-sample it per call for matching semantics.
    rand_vec = jax.random.uniform(k_rand, (1, n_actions), jnp.float32)

    actions, probs = policy_forward(hidden, w1, b1, w2, b2, rand_vec)
    jax.block_until_ready((actions, probs))

    # sanity checks against a pure-JAX f32 reference (torch layout: y = x @ W.T + b)
    y_ref = jnp.maximum(hidden @ w1.T + b1, 0.0)
    probs_ref = jax.nn.sigmoid(y_ref @ w2.T + b2)
    assert probs.shape == (batch, n_actions) and actions.shape == (batch, n_actions)
    assert jnp.allclose(probs, probs_ref, atol=2e-2), "probs mismatch"
    # actions must be exactly the threshold of the kernel's own probs
    assert jnp.array_equal(actions, (probs - rand_vec > 0.0).astype(jnp.float32)), \
        "actions inconsistent with probs"

    print("KERNEL_OK")
</pallas_src>

<mosaic_0001>
module attributes {stable_mosaic.version = 11 : i64} {
  func.func @policy_kernel(%arg0: i32, %arg1: memref<2x32xf32, #tpu.memory_space<vmem>>, %arg2: memref<64x32xf32, #tpu.memory_space<vmem>>, %arg3: memref<64x1xf32, #tpu.memory_space<vmem>>, %arg4: memref<8x64xf32, #tpu.memory_space<vmem>>, %arg5: memref<8x1xf32, #tpu.memory_space<vmem>>, %arg6: memref<8x1xf32, #tpu.memory_space<vmem>>, %arg7: memref<8x2xf32, #tpu.memory_space<vmem>>, %arg8: memref<8x2xf32, #tpu.memory_space<vmem>>) attributes {dimension_semantics = [#tpu.dimension_semantics<parallel>], iteration_bounds = array<i64: 1>, scalar_prefetch = 0 : i64, scratch_operands = 0 : i64, tpu.core_type = #tpu.core_type<tc>, window_params = [{transform_indices = @transform_0, window_bounds = array<i64: 2, 32>}, {pipeline_mode = #tpu.pipeline_mode<synchronous>, transform_indices = @transform_1, window_bounds = array<i64: 64, 32>}, {pipeline_mode = #tpu.pipeline_mode<synchronous>, transform_indices = @transform_2, window_bounds = array<i64: 64, 1>}, {pipeline_mode = #tpu.pipeline_mode<synchronous>, transform_indices = @transform_3, window_bounds = array<i64: 8, 64>}, {pipeline_mode = #tpu.pipeline_mode<synchronous>, transform_indices = @transform_4, window_bounds = array<i64: 8, 1>}, {pipeline_mode = #tpu.pipeline_mode<synchronous>, transform_indices = @transform_5, window_bounds = array<i64: 8, 1>}, {transform_indices = @transform_6, window_bounds = array<i64: 8, 2>}, {transform_indices = @transform_7, window_bounds = array<i64: 8, 2>}]} {
    %c0 = arith.constant 0 : index
    %c0_0 = arith.constant 0 : index
    %0 = vector.load %arg2[%c0, %c0_0] : memref<64x32xf32, #tpu.memory_space<vmem>>, vector<64x32xf32>
    %c0_1 = arith.constant 0 : index
    %c0_2 = arith.constant 0 : index
    %1 = vector.load %arg1[%c0_1, %c0_2] : memref<2x32xf32, #tpu.memory_space<vmem>>, vector<2x32xf32>
    %cst = arith.constant dense<0.000000e+00> : vector<64x2xf32>
    %2 = tpu.matmul %0, %1, %cst {dimension_numbers = #tpu.dot_dimension_numbers<[1], [1], [0], [0], [0, 0, 1, 0], [], []>} : vector<64x32xf32>, vector<2x32xf32>, vector<64x2xf32> -> vector<64x2xf32>
    %c0_3 = arith.constant 0 : index
    %c0_4 = arith.constant 0 : index
    %3 = vector.load %arg3[%c0_3, %c0_4] : memref<64x1xf32, #tpu.memory_space<vmem>>, vector<64x1xf32>
    %4 = vector.broadcast %3 : vector<64x1xf32> to vector<64x2xf32>
    %5 = arith.addf %2, %4 : vector<64x2xf32>
    %cst_5 = arith.constant 0.000000e+00 : f32
    %6 = vector.broadcast %cst_5 : f32 to vector<64x2xf32>
    %7 = arith.maximumf %5, %6 : vector<64x2xf32>
    %c0_6 = arith.constant 0 : index
    %c0_7 = arith.constant 0 : index
    %8 = vector.load %arg4[%c0_6, %c0_7] : memref<8x64xf32, #tpu.memory_space<vmem>>, vector<8x64xf32>
    %cst_8 = arith.constant dense<0.000000e+00> : vector<8x2xf32>
    %9 = tpu.matmul %8, %7, %cst_8 {dimension_numbers = #tpu.dot_dimension_numbers<[1], [0], [0], [1], [0, 0, 1, 1], [], []>} : vector<8x64xf32>, vector<64x2xf32>, vector<8x2xf32> -> vector<8x2xf32>
    %c0_9 = arith.constant 0 : index
    %c0_10 = arith.constant 0 : index
    %10 = vector.load %arg5[%c0_9, %c0_10] : memref<8x1xf32, #tpu.memory_space<vmem>>, vector<8x1xf32>
    %11 = vector.broadcast %10 : vector<8x1xf32> to vector<8x2xf32>
    %12 = arith.addf %9, %11 : vector<8x2xf32>
    %13 = arith.negf %12 : vector<8x2xf32>
    %14 = math.exp %13 : vector<8x2xf32>
    %cst_11 = arith.constant 1.000000e+00 : f32
    %15 = vector.broadcast %cst_11 : f32 to vector<8x2xf32>
    %16 = arith.addf %15, %14 : vector<8x2xf32>
    %17 = arith.divf %15, %16 : vector<8x2xf32>
    %c0_12 = arith.constant 0 : index
    %c0_13 = arith.constant 0 : index
    %18 = vector.load %arg8[%c0_12, %c0_13] : memref<8x2xf32, #tpu.memory_space<vmem>>, vector<8x2xf32>
    tpu.vector_store %arg8[%c0_12, %c0_13], %17 {strides = array<i32>} : memref<8x2xf32, #tpu.memory_space<vmem>>, vector<8x2xf32>,
    %c0_14 = arith.constant 0 : index
    %c0_15 = arith.constant 0 : index
    %19 = vector.load %arg6[%c0_14, %c0_15] : memref<8x1xf32, #tpu.memory_space<vmem>>, vector<8x1xf32>
    %20 = vector.broadcast %19 : vector<8x1xf32> to vector<8x2xf32>
    %21 = arith.subf %17, %20 : vector<8x2xf32>
    %cst_16 = arith.constant 0.000000e+00 : f32
    %22 = vector.broadcast %cst_16 : f32 to vector<8x2xf32>
    %23 = arith.cmpf ogt, %21, %22 : vector<8x2xf32>
    %24 = arith.extui %23 : vector<8x2xi1> to vector<8x2xi32>
    %25 = arith.sitofp %24 : vector<8x2xi32> to vector<8x2xf32>
    %c0_17 = arith.constant 0 : index
    %c0_18 = arith.constant 0 : index
    %26 = vector.load %arg7[%c0_17, %c0_18] : memref<8x2xf32, #tpu.memory_space<vmem>>, vector<8x2xf32>
    tpu.vector_store %arg7[%c0_17, %c0_18], %25 {strides = array<i32>} : memref<8x2xf32, #tpu.memory_space<vmem>>, vector<8x2xf32>,
    return
  }
  func.func @transform_0(%arg0: i32) -> (i32, i32) {
    %c0_i32 = arith.constant 0 : i32
    %c0_i32_0 = arith.constant 0 : i32
    return %arg0, %c0_i32 : i32, i32
  }
  func.func @transform_1(%arg0: i32) -> (i32, i32) {
    %c0_i32 = arith.constant 0 : i32
    %c0_i32_0 = arith.constant 0 : i32
    %c0_i32_1 = arith.constant 0 : i32
    return %c0_i32, %c0_i32_0 : i32, i32
  }
  func.func @transform_2(%arg0: i32) -> (i32, i32) {
    %c0_i32 = arith.constant 0 : i32
    %c0_i32_0 = arith.constant 0 : i32
    %c0_i32_1 = arith.constant 0 : i32
    return %c0_i32, %c0_i32_0 : i32, i32
  }
  func.func @transform_3(%arg0: i32) -> (i32, i32) {
    %c0_i32 = arith.constant 0 : i32
    %c0_i32_0 = arith.constant 0 : i32
    %c0_i32_1 = arith.constant 0 : i32
    return %c0_i32, %c0_i32_0 : i32, i32
  }
  func.func @transform_4(%arg0: i32) -> (i32, i32) {
    %c0_i32 = arith.constant 0 : i32
    %c0_i32_0 = arith.constant 0 : i32
    %c0_i32_1 = arith.constant 0 : i32
    return %c0_i32, %c0_i32_0 : i32, i32
  }
  func.func @transform_5(%arg0: i32) -> (i32, i32) {
    %c0_i32 = arith.constant 0 : i32
    %c0_i32_0 = arith.constant 0 : i32
    %c0_i32_1 = arith.constant 0 : i32
    return %c0_i32, %c0_i32_0 : i32, i32
  }
  func.func @transform_6(%arg0: i32) -> (i32, i32) {
    %c0_i32 = arith.constant 0 : i32
    %c0_i32_0 = arith.constant 0 : i32
    return %c0_i32, %arg0 : i32, i32
  }
  func.func @transform_7(%arg0: i32) -> (i32, i32) {
    %c0_i32 = arith.constant 0 : i32
    %c0_i32_0 = arith.constant 0 : i32
    return %c0_i32, %arg0 : i32, i32
  }
}

</mosaic_0001>

<bundles_post_ra>
// kernel: tpu_custom_call.1
= control target key start
LH: loop header
LB: loop body
LE: loop exit
PB: predicated region body
PF: predicated region fallthrough
CT: control target
= control target key end

     0   :  { %vm82_vm0 = vcmask 261120   ;;  %v403_v2 = vmov 0   ;;  %v404_v20 = vmov 0.0   ;;  %vm405_vm1 = vmmov 0   ;;  %s532_s0 = inlined_call_operand.vmem [shape: f32[2,32], index: 0, kind: input, shape index: {}]   ;;  %s533_s1 = inlined_call_operand.vmem [shape: f32[64,32], index: 1, kind: input, shape index: {}]   ;;  %s534_s2 = inlined_call_operand.vmem [shape: f32[64,1], index: 2, kind: input, shape index: {}]   ;;  %s535_s4 = inlined_call_operand.vmem [shape: f32[8,1], index: 4, kind: input, shape index: {}]   ;;  %s536_s5 = inlined_call_operand.vmem [shape: f32[8,1], index: 5, kind: input, shape index: {}]   ;;  %s537_s3 = inlined_call_operand.vmem [shape: f32[8,64], index: 3, kind: input, shape index: {}]   ;;  %s538_s7 = inlined_call_operand.vmem [shape: f32[8,2], index: 7, kind: output, shape index: {1}]   ;;  %s539_s6 = inlined_call_operand.vmem [shape: f32[8,2], index: 6, kind: output, shape index: {0}]  }
   0x1   :  { %v33_v0 = vld [vmem:[%s532_s0] sm:$0x3]  ;;  %397 = vset.pattern.permute.xlu0 %v403_v2  ;;  %398 = vset.pattern.permute.xlu1 %v403_v2  ;;  %v26_v3 = vld [vmem:[%s533_s1 + $0x8] sm:$0xff]  ;;  %v27_v4 = vld [vmem:[%s533_s1 + $0x10] sm:$0xff]  ;;  %vm230_vm2 = vcmask 523264   ;;  %vm310_vm3 = vcmask 15360  }
   0x2   :  { %v25_v1 = vld [vmem:[%s533_s1] sm:$0xff]  ;;  %361 = vmatprep.subr.msk.mxu0 %vm82_vm0, %v33_v0  ;;  %v41_v5 = vld [vmem:[%s534_s2 + $0x38] sm:$0xff]  ;;  %v39_v6 = vld [vmem:[%s534_s2 + $0x28] sm:$0xff]  ;;  %375 = vmatprep.subr.mxu1 %v404_v20 }
   0x3   :  { %363 = vmatprep.mubr.msk.f32.mxu0 %vm82_vm0, %v25_v1  ;;  %362 = vmatpush3.xpose.msk.msra.mxu0 %vm82_vm0, %v33_v0  ;;  %v40_v7 = vld [vmem:[%s534_s2 + $0x30] sm:$0xff]  ;;  %v38_v8 = vld [vmem:[%s534_s2 + $0x20] sm:$0xff]  ;;  %v28_v9 = vld [vmem:[%s533_s1 + $0x18] sm:$0xff] }
   0x4   :  { %79 = vperm.xlu0 %397, %v41_v5   ;;  %69 = vperm.xlu1 %398, %v39_v6   ;;  %v29_v10 = vld [vmem:[%s533_s1 + $0x20] sm:$0xff]  ;;  %v37_v11 = vld [vmem:[%s534_s2 + $0x18] sm:$0xff]  ;;  %v36_v12 = vld [vmem:[%s534_s2 + $0x10] sm:$0xff] }
   0x5   :  { %v30_v13 = vld [vmem:[%s533_s1 + $0x28] sm:$0xff]  ;;  %v31_v14 = vld [vmem:[%s533_s1 + $0x30] sm:$0xff]  ;;  %v34_v16 = vld [vmem:[%s534_s2] sm:$0xff]  ;;  %391 = vmatprep.mubr.msk.f32.mxu1 %vm405_vm1, %v404_v20 }
   0x6   :  { %364 = vmatmul.mubr.msk.f32.vlgmr.msra.gmra.mxu0 %vm82_vm0, %v26_v3  ;;  %v35_v15 = vld [vmem:[%s534_s2 + $0x8] sm:$0xff]  ;;  %v32_v17 = vld [vmem:[%s533_s1 + $0x38] sm:$0xff]  ;;  %v224_v18 = vld [vmem:[%s535_s4] sm:$0xff] }
   0x7   :  { %366 = vmatprep.mubr.msk.f32.mxu0 %vm82_vm0, %v27_v4  ;;  %v312_v19 = vld [vmem:[%s536_s5] sm:$0xff] }
   0x8   :  { %74 = vperm.xlu0 %397, %v40_v7   ;;  %64 = vperm.xlu1 %398, %v38_v8   ;;  %v223_v53 = vld [vmem:[%s537_s3] sm:$0xff] }
   0xa   :  { %367 = vmatmul.mubr.msk.f32.gmra.mxu0 %vm82_vm0, %v28_v9 }
   0xb   :  { %369 = vmatprep.mubr.msk.f32.mxu0 %vm82_vm0, %v29_v10 }
   0xc   :  { %59 = vperm.xlu0 %397, %v37_v11   ;;  %54 = vperm.xlu1 %398, %v36_v12  }
   0xe   :  { %370 = vmatmul.mubr.msk.f32.gmra.mxu0 %vm82_vm0, %v30_v13 }
   0xf   :  { %372 = vmatprep.mubr.msk.f32.mxu0 %vm82_vm0, %v31_v14 }
  0x10   :  { %49 = vperm.xlu0 %397, %v35_v15   ;;  %44 = vperm.xlu1 %398, %v34_v16  }
  0x12   :  { %373 = vmatmul.mubr.msk.f32.gmra.mxu0 %vm82_vm0, %v32_v17 }
  0x14   :  { %227 = vperm.xlu0 %397, %v224_v18   ;;  %315 = vperm.xlu1 %398, %v312_v19  }
  0x7f   :  { %v80_v22 = vpop.permute.xlu0 %79  ;;  %v70_v24 = vpop.permute.xlu1 %69 }
  0x83   :  { %v75_v27 = vpop.permute.xlu0 %74  ;;  %v65_v29 = vpop.permute.xlu1 %64 }
  0x87   :  { %v60_v33 = vpop.permute.xlu0 %59  ;;  %v55_v38 = vpop.permute.xlu1 %54 }
  0x8b   :  { %v50_v43 = vpop.permute.xlu0 %49  ;;  %v45_v46 = vpop.permute.xlu1 %44 }
  0x8f   :  { %v228_v54 = vpop.permute.xlu0 %227  ;;  %v316_v62 = vpop.permute.xlu1 %315 }
  0xc6   :  { %v365_v21 = vpop.f32.mrf.mxu0 }
  0xc7   :  { %v182_v47 = vadd.f32 %v365_v21, %v50_v43 }
  0xc8   :  { %v176_v23 = vpop.f32.mrf.mxu0 }
  0xc9   :  { %v177_v49 = vadd.f32 %v176_v23, %v45_v46  ;;  %v216_v51 = vmax.f32 %v182_v47, 0.0 }
  0xca   :  { %v368_v25 = vpop.f32.mrf.mxu0 }
  0xcb   :  { %v192_v41 = vadd.f32 %v368_v25, %v60_v33  ;;  %v215_v52 = vmax.f32 %v177_v49, 0.0 }
  0xcc   :  { %v186_v26 = vpop.f32.mrf.mxu0 }
  0xcd   :  { %v187_v44 = vadd.f32 %v186_v26, %v55_v38  ;;  %v218_v48 = vmax.f32 %v192_v41, 0.0 }
  0xce   :  { %v371_v28 = vpop.f32.mrf.mxu0 }
  0xcf   :  { %v202_v35 = vadd.f32 %v371_v28, %v70_v24  ;;  %v217_v50 = vmax.f32 %v187_v44, 0.0 }
  0xd0   :  { %v196_v30 = vpop.f32.mrf.mxu0 }
  0xd1   :  { %v197_v39 = vadd.f32 %v196_v30, %v65_v29  ;;  %v220_v42 = vmax.f32 %v202_v35, 0.0 }
  0xd2   :  { %v374_v31 = vpop.f32.mrf.mxu0 }
  0xd3   :  { %v212_v32 = vadd.f32 %v374_v31, %v80_v22  ;;  %v219_v45 = vmax.f32 %v197_v39, 0.0 }
  0xd4   :  { %v206_v34 = vpop.f32.mrf.mxu0 }
  0xd5   :  { %v222_v36 = vmax.f32 %v212_v32, 0.0  ;;  %v207_v37 = vadd.f32 %v206_v34, %v75_v27 }
  0xd7   :  { %v221_v40 = vmax.f32 %v207_v37, 0.0  ;;  %376 = vmatpush3.msra.mxu1 %v222_v36 }
  0xd8   :  { %377 = vmatprep.subr.mxu1 %v404_v20 }
  0xd9   :  { %378 = vmatpush3.msra.mxu1 %v221_v40 }
  0xda   :  { %379 = vmatprep.subr.mxu1 %v404_v20 }
  0xdb   :  { %380 = vmatpush3.msra.mxu1 %v220_v42 }
  0xdc   :  { %381 = vmatprep.subr.mxu1 %v404_v20 }
  0xdd   :  { %382 = vmatpush3.msra.mxu1 %v219_v45 }
  0xde   :  { %383 = vmatprep.subr.mxu1 %v404_v20 }
  0xdf   :  { %384 = vmatpush3.msra.mxu1 %v218_v48 }
  0xe0   :  { %385 = vmatprep.subr.mxu1 %v404_v20 }
  0xe1   :  { %386 = vmatpush3.msra.mxu1 %v217_v50 }
  0xe2   :  { %387 = vmatprep.subr.mxu1 %v404_v20 }
  0xe3   :  { %388 = vmatpush3.msra.mxu1 %v216_v51 }
  0xe4   :  { %389 = vmatprep.subr.mxu1 %v404_v20 }
  0xe5   :  { %390 = vmatpush3.msra.mxu1 %v215_v52 }
  0xe6   :  { %392 = vmatmul.mubr.msk.f32.vlgmr.msra.gmra.mxu1 %vm230_vm2, %v223_v53 }
 0x1a6   :  { %v300_v55 = vpop.f32.mrf.mxu1 }
 0x1a7   :  { %v301_v56 = vadd.f32 %v300_v55, %v228_v54 }
 0x1a8   :  { %v393_v57 = vpop.f32.mrf.mxu1 }
 0x1a9   :  { %v341_v58 = vmul.f32 -1.442695, %v301_v56 }
 0x1ab   :  { %399 = vpow2.f32 %v341_v58 }
 0x1b8   :  { %v400_v59 = vpop.eup %399 }
 0x1b9   :  { %v307_v60 = vadd.f32 1.0, %v400_v59 }
 0x1bb   :  { %401 = vrcp.f32 %v307_v60 }
 0x1c8   :  { %v402_v61 = vpop.eup %401 }
 0x1c9   :  { %311 = vst.msk [vmem:[%s538_s7] sm:$0xff] %vm310_vm3, %v402_v61  ;;  %v318_v63 = vsub.f32 %v402_v61, %v316_v62 }
 0x1cb   :  { %vm319_vm4 = vcmp.gt.f32.partialorder %v318_v63, 0.0 }
 0x1cc   :  { %v342_v0 = vsel %vm319_vm4, 1.0, %v404_v20 }
 0x1cd   :  { %322 = vst.msk [vmem:[%s539_s6] sm:$0xff] %vm310_vm3, %v342_v0 }

</bundles_post_ra>
